<compile_context>
chip_gen: v7x
topology: tpu7x:2x2x1
jax: 0.10.0
libtpu: 0.0.40
codegen_flags: <defaults>
</compile_context>

<pallas_src>
import math

import jax
import jax.numpy as jnp
from jax import lax
from jax.experimental import pallas as pl
from jax.experimental.pallas import tpu as pltpu

EPS = 1e-5


def bn_relu_dropout_kernel(x_ref, scale_ref, shift_ref, o_ref):
    # Elementwise hot path for one row tile: y = relu(x * scale + shift).
    s = scale_ref[...]                                   # (1, Cw), compute dtype
    b = shift_ref[...]
    x = x_ref[...].astype(s.dtype)                       # (tile_n, Cw)
    y = jnp.maximum(x * s + b, 0.0)
    # Dropout: inference-mode identity.
    # TODO(synk): training-mode dropout (PRNG mask + 1/(1-p) scale) not emitted;
    # this module is used on the inference path.
    o_ref[...] = y.astype(o_ref.dtype)


def _chip_config():
    """Pick block size / VMEM budget / bf16-compute policy per TPU generation."""
    try:
        kind = jax.devices()[0].device_kind.lower()
    except Exception:  # pragma: no cover - be conservative if query fails
        kind = ""
    if "v7" in kind or "7x" in kind:
        # 6 MiB block -> ~24 MiB double-buffered in+out footprint; raise the
        # scoped VMEM limit explicitly but stay well under the 64 MiB physical.
        return dict(target_block_bytes=6 << 20, vmem_limit_bytes=40 << 20, bf16_ok=True)
    if "v6" in kind:
        # 4 MiB block -> ~16 MiB footprint, under the 32 MiB default scoped VMEM.
        return dict(target_block_bytes=4 << 20, vmem_limit_bytes=None, bf16_ok=True)
    if "v5e" in kind or "v5 lite" in kind or "v5lite" in kind:
        # 2 MiB block -> ~8 MiB footprint, under the 16 MiB default scoped VMEM.
        return dict(target_block_bytes=2 << 20, vmem_limit_bytes=None, bf16_ok=False)
    # Unknown chip: conservative defaults.
    return dict(target_block_bytes=2 << 20, vmem_limit_bytes=None, bf16_ok=False)


def _choose_tile_rows(n_rows, row_width, dtype_bytes, target_block_bytes, sublane):
    """Row-tile size ~target_block_bytes, sublane-aligned, >=2 steps when big."""
    bytes_per_row = max(1, row_width * dtype_bytes)
    total_bytes = n_rows * bytes_per_row
    rows = max(sublane, (target_block_bytes // bytes_per_row) // sublane * sublane)
    if rows >= n_rows:
        # Whole array fits in one block.  Split into 2 steps only when the
        # tensor is big enough that sharding across 2 TensorCores pays off.
        if total_bytes >= (1 << 20) and n_rows >= 2 * sublane:
            half = n_rows // 2
            rows = -(-half // sublane) * sublane
            return min(rows, n_rows)
        return n_rows
    # Prefer an even number of grid steps so the two v7x TCs stay balanced.
    steps = -(-n_rows // rows)
    if steps > 1 and steps % 2 == 1:
        steps += 1
        rows = -(-(-(-n_rows // steps)) // sublane) * sublane
        rows = max(rows, sublane)
    return rows


def _run(x2d, scale_row, shift_row, *, tile_rows, vmem_limit_bytes):
    """One pallas_call over a (Nr, Cw) slab with resident (1, Cw) params."""
    Nr, Cw = x2d.shape
    grid = (pl.cdiv(Nr, tile_rows),)
    row_spec = pl.BlockSpec((tile_rows, Cw), lambda i: (i, 0))
    par_spec = pl.BlockSpec((1, Cw), lambda i: (0, 0))      # resident params

    cp_kwargs = dict(
        dimension_semantics=("parallel",),
        allow_input_fusion=[True, True, True],
    )
    if vmem_limit_bytes is not None:
        cp_kwargs["vmem_limit_bytes"] = vmem_limit_bytes

    return pl.pallas_call(
        bn_relu_dropout_kernel,
        out_shape=jax.ShapeDtypeStruct((Nr, Cw), x2d.dtype),
        grid=grid,
        in_specs=[row_spec, par_spec, par_spec],
        out_specs=row_spec,
        compiler_params=pltpu.CompilerParams(**cp_kwargs),
    )(x2d, scale_row, shift_row)


def bn_relu_dropout(x, gamma, beta, running_mean, running_var, *, eps=EPS):
    """x: (N, C). Per-channel BN params: (C,) each. Returns ReLU(BN(x))."""
    N, C = x.shape
    out_dtype = x.dtype
    cfg = _chip_config()

    # Fold BatchNorm into a single scale/shift pair (tiny one-off XLA ops):
    #   scale = gamma / sqrt(var + eps),  shift = beta - mean * scale
    inv_std = lax.rsqrt(running_var.astype(jnp.float32) + eps)
    scale = gamma.astype(jnp.float32) * inv_std                        # (C,)
    shift = beta.astype(jnp.float32) - running_mean.astype(jnp.float32) * scale

    # Compute dtype: keep bf16 end-to-end on chips with a bf16 VPU (v6e/v7x);
    # always fold the BN constants in f32 first for accuracy.
    compute_dtype = jnp.float32
    if cfg["bf16_ok"] and out_dtype == jnp.bfloat16:
        compute_dtype = jnp.bfloat16
    scale = scale.astype(compute_dtype)
    shift = shift.astype(compute_dtype)

    dtype_bytes = jnp.dtype(out_dtype).itemsize
    sublane = 8 * max(1, 4 // dtype_bytes)   # 8 (f32), 16 (bf16), 32 (i8/fp8)

    # Lane-dense folding factor: fold k consecutive rows so the last dim is a
    # multiple of 128 (a free reshape for contiguous row-major data).
    if C % 128 == 0:
        k = 1
    else:
        k = math.lcm(C, 128) // C
    N_main = (N // k) * k
    if N_main == 0:          # fewer rows than one fold group: narrow-C only
        k = 1
        N_main = N

    # --- lane-dense main slab: first floor(N/k)*k rows -----------------------
    Nr, Cw = N_main // k, C * k
    x_main = x[:N_main].reshape(Nr, Cw)
    scale_main = (jnp.tile(scale, k) if k > 1 else scale).reshape(1, Cw)
    shift_main = (jnp.tile(shift, k) if k > 1 else shift).reshape(1, Cw)

    tile_rows = _choose_tile_rows(Nr, Cw, dtype_bytes,
                                  cfg["target_block_bytes"], sublane)
    out_main = _run(x_main, scale_main, shift_main,
                    tile_rows=tile_rows,
                    vmem_limit_bytes=cfg["vmem_limit_bytes"]).reshape(N_main, C)

    if N_main == N:
        return out_main

    # --- remainder: < k leftover rows, tiny second call (masked stores OK) ---
    x_rem = x[N_main:]
    rem_rows = N - N_main
    out_rem = _run(x_rem, scale.reshape(1, C), shift.reshape(1, C),
                   tile_rows=rem_rows, vmem_limit_bytes=None)
    return jnp.concatenate([out_main, out_rem], axis=0)


def reference(x, gamma, beta, running_mean, running_var):
    y = (x.astype(jnp.float32) - running_mean[None, :]) / jnp.sqrt(
        running_var[None, :] + EPS)
    y = y * gamma[None, :] + beta[None, :]
    return jnp.maximum(y, 0.0)


def _make_params(key, C):
    km, kv, kg, kb = jax.random.split(key, 4)
    gamma = 1.0 + 0.1 * jax.random.normal(kg, (C,), dtype=jnp.float32)   # bn.weight
    beta = 0.1 * jax.random.normal(kb, (C,), dtype=jnp.float32)          # bn.bias
    mean = 0.05 * jax.random.normal(km, (C,), dtype=jnp.float32)         # running_mean
    var = 0.5 + jax.random.uniform(kv, (C,), dtype=jnp.float32)          # running_var > 0
    return gamma, beta, mean, var


if __name__ == "__main__":
    key = jax.random.PRNGKey(0)
    k1, k2, k3, kp = jax.random.split(key, 4)
    gamma32, beta32, mean32, var32 = _make_params(kp, 32)
    gamma24, beta24, mean24, var24 = _make_params(kp, 24)

    # Case 1: canonical shape from the module (batch=2, seq=8, hidden=32),
    # N = batch*seq = 16, C = input_size = 32 -> k=4 lane-dense path.
    N1, C1 = 16, 32
    x1 = jax.random.normal(k1, (N1, C1), dtype=jnp.float32)
    out1 = jax.block_until_ready(bn_relu_dropout(x1, gamma32, beta32, mean32, var32))
    ref1 = reference(x1, gamma32, beta32, mean32, var32)
    assert out1.shape == (N1, C1) and out1.dtype == jnp.float32
    assert jnp.max(jnp.abs(out1 - ref1)) < 2e-5, "case1 mismatch vs reference"

    # Case 2: awkward N with remainder rows (k=16 for C=24, N=19 -> 16 + 3).
    N2, C2 = 19, 24
    x2 = jax.random.normal(k2, (N2, C2), dtype=jnp.float32)
    out2 = jax.block_until_ready(bn_relu_dropout(x2, gamma24, beta24, mean24, var24))
    ref2 = reference(x2, gamma24, beta24, mean24, var24)
    assert out2.shape == (N2, C2) and out2.dtype == jnp.float32
    assert jnp.max(jnp.abs(out2 - ref2)) < 2e-5, "case2 mismatch vs reference"

    # Case 3: bf16 activations (looser tolerance; bf16 compute on v6e/v7x,
    # f32 compute on v5e).
    N3, C3 = 16, 32
    x3 = jax.random.normal(k3, (N3, C3), dtype=jnp.float32).astype(jnp.bfloat16)
    out3 = jax.block_until_ready(bn_relu_dropout(x3, gamma32, beta32, mean32, var32))
    ref3 = reference(x3, gamma32, beta32, mean32, var32)
    assert out3.shape == (N3, C3) and out3.dtype == jnp.bfloat16
    assert jnp.max(jnp.abs(out3.astype(jnp.float32) - ref3)) < 8e-2, \
        "case3 (bf16) mismatch vs reference"

    print("KERNEL_OK")
</pallas_src>

<mosaic_0001>
module attributes {stable_mosaic.version = 11 : i64} {
  func.func @bn_relu_dropout_kernel(%arg0: i32, %arg1: memref<4x128xf32, #tpu.memory_space<vmem>>, %arg2: memref<1x128xf32, #tpu.memory_space<vmem>>, %arg3: memref<1x128xf32, #tpu.memory_space<vmem>>, %arg4: memref<4x128xf32, #tpu.memory_space<vmem>>) attributes {dimension_semantics = [#tpu.dimension_semantics<parallel>], iteration_bounds = array<i64: 1>, scalar_prefetch = 0 : i64, scratch_operands = 0 : i64, tpu.core_type = #tpu.core_type<tc>, window_params = [{transform_indices = @transform_0, window_bounds = array<i64: 4, 128>}, {pipeline_mode = #tpu.pipeline_mode<synchronous>, transform_indices = @transform_1, window_bounds = array<i64: 1, 128>}, {pipeline_mode = #tpu.pipeline_mode<synchronous>, transform_indices = @transform_2, window_bounds = array<i64: 1, 128>}, {transform_indices = @transform_3, window_bounds = array<i64: 4, 128>}]} {
    %c0 = arith.constant 0 : index
    %c0_0 = arith.constant 0 : index
    %0 = vector.load %arg2[%c0, %c0_0] : memref<1x128xf32, #tpu.memory_space<vmem>>, vector<1x128xf32>
    %c0_1 = arith.constant 0 : index
    %c0_2 = arith.constant 0 : index
    %1 = vector.load %arg3[%c0_1, %c0_2] : memref<1x128xf32, #tpu.memory_space<vmem>>, vector<1x128xf32>
    %c0_3 = arith.constant 0 : index
    %c0_4 = arith.constant 0 : index
    %2 = vector.load %arg1[%c0_3, %c0_4] : memref<4x128xf32, #tpu.memory_space<vmem>>, vector<4x128xf32>
    %3 = vector.broadcast %0 : vector<1x128xf32> to vector<4x128xf32>
    %4 = arith.mulf %2, %3 : vector<4x128xf32>
    %5 = vector.broadcast %1 : vector<1x128xf32> to vector<4x128xf32>
    %6 = arith.addf %4, %5 : vector<4x128xf32>
    %cst = arith.constant 0.000000e+00 : f32
    %7 = vector.broadcast %cst : f32 to vector<4x128xf32>
    %8 = arith.maximumf %6, %7 : vector<4x128xf32>
    %c0_5 = arith.constant 0 : index
    %c0_6 = arith.constant 0 : index
    %9 = vector.load %arg4[%c0_5, %c0_6] : memref<4x128xf32, #tpu.memory_space<vmem>>, vector<4x128xf32>
    tpu.vector_store %arg4[%c0_5, %c0_6], %8 {strides = array<i32>} : memref<4x128xf32, #tpu.memory_space<vmem>>, vector<4x128xf32>,
    return
  }
  func.func @transform_0(%arg0: i32) -> (i32, i32) {
    %c0_i32 = arith.constant 0 : i32
    %c0_i32_0 = arith.constant 0 : i32
    return %arg0, %c0_i32 : i32, i32
  }
  func.func @transform_1(%arg0: i32) -> (i32, i32) {
    %c0_i32 = arith.constant 0 : i32
    %c0_i32_0 = arith.constant 0 : i32
    %c0_i32_1 = arith.constant 0 : i32
    return %c0_i32, %c0_i32_0 : i32, i32
  }
  func.func @transform_2(%arg0: i32) -> (i32, i32) {
    %c0_i32 = arith.constant 0 : i32
    %c0_i32_0 = arith.constant 0 : i32
    %c0_i32_1 = arith.constant 0 : i32
    return %c0_i32, %c0_i32_0 : i32, i32
  }
  func.func @transform_3(%arg0: i32) -> (i32, i32) {
    %c0_i32 = arith.constant 0 : i32
    %c0_i32_0 = arith.constant 0 : i32
    return %arg0, %c0_i32 : i32, i32
  }
}

</mosaic_0001>

<bundles_post_ra>
// kernel: tpu_custom_call.1
= control target key start
LH: loop header
LB: loop body
LE: loop exit
PB: predicated region body
PF: predicated region fallthrough
CT: control target
= control target key end

     0   :  { %8 = vsyncpa [#allocation3], 0  ;;  %s165_s0 = inlined_call_operand.hbm [shape: f32[4,128], index: 0, kind: input, shape index: {}]   ;;  %s166_s1 = inlined_call_operand.vmem [shape: f32[1,128], index: 1, kind: input, shape index: {}]   ;;  %s167_s2 = inlined_call_operand.vmem [shape: f32[1,128], index: 2, kind: input, shape index: {}]   ;;  %s168_s3 = inlined_call_operand.hbm [shape: f32[4,128], index: 3, kind: output, shape index: {}]  }
   0x1   :  { %9 = vsyncpa [#allocation4], 0  ;;  %s113_s12 = smov [#allocation2]   ;;  %s65_s16 = scalar_lea.hbm %s165_s0, 64 }
   0x2   :  { %s16_s13 = sshll.u32 %s113_s12, 4  ;;  %p66_p0 = scmp.ne.s32.totalorder %s165_s0, %s65_s16  ;;  %s17_s13 = int_to_ptr.vmem [resolvable:$true] %s16_s13 }
   0x3   :  { %p69_p1 = scmp.lt.u32.totalorder %s65_s16, %s165_s0 }
   0x5   :  { %p71_p2 = pnand %p69_p1, %p66_p0 }
   0x7   :  { %74 = shalt.err (!%p71_p2)
}
   0x8   :  { %s75_s21 = scalar_lea.vmem %s17_s13, 64  ;;  %p80_p4 = scmp.lt.s32.totalorder %s17_s13, %s17_s13 }
   0x9   :  { %p76_p3 = scmp.ne.s32.totalorder %s17_s13, %s75_s21  ;;  %p81_p5 = scmp.lt.s32.totalorder %s75_s21, %s75_s21 }
   0xb   :  { %p82_p6 = por %p81_p5, %p80_p4 }
   0xd   :  { %p83_p7 = pnand %p82_p6, %p76_p3 }
   0xf   :  { %86 = shalt.err (!%p83_p7)
}
  0x10   :  { %19 = dma.hbm_to_vmem [thread:$0]  %s165_s0, 64, %s17_s13, [#allocation3]  }
  0x11   :  { %109 = dma.done.wait [#allocation3], 64  }
  0x12   :  { %110 = vsyncadd [#allocation3], 4294967232  ;;  %v61_v0 = vld [vmem:[%s166_s1] ss:$0 sm:$0xff]  ;;  %s114_s28 = smov [#allocation5]  }
  0x13   :  { %v62_v1 = vld [vmem:[%s167_s2] ss:$0 sm:$0xff]  ;;  %s52_s29 = sshll.u32 %s114_s28, 4  ;;  %s53_s29 = int_to_ptr.vmem [resolvable:$true] %s52_s29 }
  0x14   :  { %v29_v2 = vld [vmem:[#allocation2] sm:$0xf]  ;;  %s87_s30 = scalar_lea.vmem %s53_s29, 64  ;;  %p92_p9 = scmp.lt.s32.totalorder %s53_s29, %s53_s29 }
  0x15   :  { %v36_v3 = vmul.f32 %v61_v0, %v29_v2  ;;  %p88_p8 = scmp.ne.s32.totalorder %s53_s29, %s87_s30  ;;  %p93_p10 = scmp.lt.s32.totalorder %s87_s30, %s87_s30 }
  0x17   :  { %v43_v4 = vadd.f32 %v62_v1, %v36_v3  ;;  %p94_p11 = por %p93_p10, %p92_p9 }
  0x19   :  { %v44_v5 = vmax.f32 %v43_v4, 0.0  ;;  %p95_p12 = pnand %p94_p11, %p88_p8 }
  0x1b   :  { %45 = vst [vmem:[#allocation5] sm:$0xf] %v44_v5 }
  0x1c   :  { %98 = shalt.err (!%p95_p12)
}
  0x1d   :  { %s99_s4 = scalar_lea.hbm %s168_s3, 64 }
  0x1e   :  { %p100_p13 = scmp.ne.s32.totalorder %s168_s3, %s99_s4  ;;  %p103_p0 = scmp.lt.u32.totalorder %s99_s4, %s168_s3 }
  0x20   :  { %p105_p1 = pnand %p103_p0, %p100_p13 }
  0x22   :  { %108 = shalt.err (!%p105_p1)
}
  0x23   :  { %55 = dma.vmem_to_hbm [thread:$0]  %s53_s29, 64, %s168_s3, [#allocation4]  }
  0x24   :  { %111 = dma.done.wait [#allocation4], 64  }
  0x25   :  { %112 = vsyncadd [#allocation4], 4294967232 }
  0x26   :  { %59 = vsyncpa [#allocation3], 1 }
  0x27   :  { %60 = vsyncpa [#allocation4], 1 }

</bundles_post_ra>
